<compile_context>
chip_gen: v6e
topology: v6e:2x2x1
jax: 0.10.0
libtpu: 0.0.40
codegen_flags: <defaults>
</compile_context>

<pallas_src>
import math

import jax
import jax.numpy as jnp
from jax.experimental import pallas as pl
from jax.experimental.pallas import tpu as pltpu


# ----------------------------- Pallas kernel -------------------------------

def _dct_adapter_kernel(x_ref, a_ref, wd_ref, wu_ref, o_ref):
    """One row-tile of the folded DCTAdapter forward pass.

    x_ref  : [TM, Dp]  input rows (f32 or bf16)
    a_ref  : [Dp, Dp]  folded residual/reconstruction matrix A
    wd_ref : [Dp, Hp]  folded adapter-down weight
    wu_ref : [Hp, Dp]  folded adapter-up weight
    o_ref  : [TM, Dp]  output rows (f32)
    """
    x = x_ref[...]

    # Residual + untouched-coefficient reconstruction: x @ A
    base = jnp.dot(x, a_ref[...], preferred_element_type=jnp.float32)

    # Adapter branch: relu(x @ Wd_f) @ Wu_f   (ReLU in f32)
    z = jnp.dot(x, wd_ref[...], preferred_element_type=jnp.float32)
    z = jnp.maximum(z, 0.0).astype(wu_ref.dtype)
    adapt = jnp.dot(z, wu_ref[...], preferred_element_type=jnp.float32)

    o_ref[...] = (base + adapt).astype(o_ref.dtype)


# ----------------------------- host wrapper --------------------------------

def _round_up(x, m):
    return ((x + m - 1) // m) * m


def create_dct_matrix(N, dtype=jnp.float32):
    n = jnp.arange(N, dtype=dtype)[None, :]
    k = jnp.arange(N, dtype=dtype)[:, None]
    dct = jnp.cos(math.pi * (2.0 * n + 1.0) * k / (2.0 * N))
    dct = dct.at[0].multiply(1.0 / math.sqrt(2.0))
    dct = dct * math.sqrt(2.0 / N)
    return dct


def dct_adapter_forward(hidden_states, w_down, w_up, num_components=24,
                        tm=512, use_bf16=False):
    """hidden_states: [B, S, D].  w_down: [256, nc], w_up: [nc, 256]."""
    B, S, D = hidden_states.shape
    M = B * S
    out_dtype = hidden_states.dtype
    nc = num_components
    hidden_dim = w_down.shape[0]                      # 256

    # ---- fold DCT + slice + inverse DCT into the weights (f32, exact) -------
    dct = create_dct_matrix(D, jnp.float32)           # [D, D]
    dct_nc = dct[:nc, :]                              # [nc, D]
    a_mat = (jnp.eye(D, dtype=jnp.float32)
             + dct.T @ dct - dct_nc.T @ dct_nc)       # [D, D]
    wd_f = dct_nc.T @ w_down.T.astype(jnp.float32)    # [D, 256]
    wu_f = w_up.T.astype(jnp.float32) @ dct_nc        # [256, D]

    compute_dtype = jnp.bfloat16 if use_bf16 else jnp.float32

    # ---- pad to lane/sublane friendly shapes ---------------------------------
    Dp = _round_up(D, 128)                 # lane-dense last dim
    Hp = _round_up(hidden_dim, 128)        # adapter hidden width (256 already)
    TM = min(tm, _round_up(M, 8))          # row tile (multiple of 8 sublanes)
    Mp = _round_up(M, TM)                  # pad rows instead of asserting M%TM
    grid = (Mp // TM,)

    x2d = hidden_states.reshape(M, D)
    x_pad = jnp.zeros((Mp, Dp), compute_dtype).at[:M, :D].set(
        x2d.astype(compute_dtype))
    a_pad = jnp.zeros((Dp, Dp), compute_dtype).at[:D, :D].set(
        a_mat.astype(compute_dtype))
    wd_pad = jnp.zeros((Dp, Hp), compute_dtype).at[:D, :hidden_dim].set(
        wd_f.astype(compute_dtype))
    wu_pad = jnp.zeros((Hp, Dp), compute_dtype).at[:hidden_dim, :D].set(
        wu_f.astype(compute_dtype))

    # ---- VMEM budget & scheduler cost hint -----------------------------------
    itemsize = jnp.dtype(compute_dtype).itemsize
    tile_bytes = TM * Dp * (itemsize + 4)                    # x tile + f32 out tile
    const_bytes = (Dp * Dp + 2 * Dp * Hp) * itemsize         # A, Wd_f, Wu_f
    est = 2 * (tile_bytes + const_bytes) + (2 << 20)         # double-buffered + slack
    vmem_limit = int(min(max(est, 16 << 20), 64 << 20))
    # TODO(synk): on v7x (64 MiB VMEM) with very large D, single-buffer the
    # grid-invariant constant operands instead of relying on the limit alone.

    cost = pl.CostEstimate(
        flops=2 * Mp * Dp * (Dp + 2 * Hp),
        transcendentals=0,
        bytes_accessed=(Mp * Dp * (itemsize + 4)
                        + (Dp * Dp + 2 * Dp * Hp) * itemsize),
    )

    out = pl.pallas_call(
        _dct_adapter_kernel,
        out_shape=jax.ShapeDtypeStruct((Mp, Dp), jnp.float32),
        grid_spec=pltpu.PrefetchScalarGridSpec(
            num_scalar_prefetch=0,
            grid=grid,
            in_specs=[
                pl.BlockSpec((TM, Dp), lambda i: (i, 0)),    # x rows
                pl.BlockSpec((Dp, Dp), lambda i: (0, 0)),    # folded A
                pl.BlockSpec((Dp, Hp), lambda i: (0, 0)),    # folded adapter down
                pl.BlockSpec((Hp, Dp), lambda i: (0, 0)),    # folded adapter up
            ],
            out_specs=pl.BlockSpec((TM, Dp), lambda i: (i, 0)),
        ),
        compiler_params=pltpu.CompilerParams(
            dimension_semantics=("parallel",),
            vmem_limit_bytes=vmem_limit),
        cost_estimate=cost,
    )(x_pad, a_pad, wd_pad, wu_pad)

    return out[:M, :D].reshape(B, S, D).astype(out_dtype)


# pure-JAX reference (mirrors the PyTorch forward) for a correctness check
def _reference_forward(hidden_states, w_down, w_up, num_components=24):
    B, S, D = hidden_states.shape
    dct_mat = create_dct_matrix(D, jnp.float32)
    h_dct = hidden_states.astype(jnp.float32) @ dct_mat.T
    z = h_dct[:, :, :num_components].reshape(-1, num_components)
    z_pert = jnp.maximum(z @ w_down.T, 0.0) @ w_up.T
    h_mod = h_dct.at[:, :, :num_components].set(
        z_pert.reshape(B, S, num_components))
    return h_mod @ dct_mat + hidden_states


# --------------------------------- main -------------------------------------

if __name__ == "__main__":
    key = jax.random.PRNGKey(0)
    k_x, k_d, k_u = jax.random.split(key, 3)

    B, S, D = 2, 8, 32          # batch, seq, input_dim
    NC, HIDDEN = 24, 256        # num_components, adapter hidden width

    x = jax.random.normal(k_x, (B, S, D), dtype=jnp.float32)
    # Deterministic synthetic parameters (shapes match nn.Linear weights).
    w_down = 0.05 * jax.random.normal(k_d, (HIDDEN, NC), dtype=jnp.float32)
    w_up = 0.05 * jax.random.normal(k_u, (NC, HIDDEN), dtype=jnp.float32)

    ref = _reference_forward(x, w_down, w_up, num_components=NC)

    # f32 path (exact semantics up to float reassociation of the weight fold).
    out = dct_adapter_forward(x, w_down, w_up, num_components=NC)
    out = jax.block_until_ready(out)
    assert out.shape == (B, S, D)
    assert jnp.allclose(out, ref, atol=2e-4, rtol=2e-4), "f32 mismatch vs reference"

    # bf16-operand / f32-accumulate fast path (v6e/v7x), looser tolerance.
    out_bf16 = dct_adapter_forward(x, w_down, w_up, num_components=NC,
                                   use_bf16=True)
    out_bf16 = jax.block_until_ready(out_bf16)
    assert jnp.allclose(out_bf16, ref, atol=1e-1, rtol=1e-1), \
        "bf16 mismatch vs reference"

    print("KERNEL_OK")
</pallas_src>

<mosaic_0001>
module attributes {stable_mosaic.version = 11 : i64} {
  func.func @_dct_adapter_kernel(%arg0: i32, %arg1: memref<16x128xf32, #tpu.memory_space<vmem>>, %arg2: memref<128x128xf32, #tpu.memory_space<vmem>>, %arg3: memref<128x256xf32, #tpu.memory_space<vmem>>, %arg4: memref<256x128xf32, #tpu.memory_space<vmem>>, %arg5: memref<16x128xf32, #tpu.memory_space<vmem>>) attributes {dimension_semantics = [#tpu.dimension_semantics<parallel>], iteration_bounds = array<i64: 1>, scalar_prefetch = 0 : i64, scratch_operands = 0 : i64, tpu.core_type = #tpu.core_type<tc>, window_params = [{transform_indices = @transform_0, window_bounds = array<i64: 16, 128>}, {pipeline_mode = #tpu.pipeline_mode<synchronous>, transform_indices = @transform_1, window_bounds = array<i64: 128, 128>}, {pipeline_mode = #tpu.pipeline_mode<synchronous>, transform_indices = @transform_2, window_bounds = array<i64: 128, 256>}, {pipeline_mode = #tpu.pipeline_mode<synchronous>, transform_indices = @transform_3, window_bounds = array<i64: 256, 128>}, {transform_indices = @transform_4, window_bounds = array<i64: 16, 128>}]} {
    %c0 = arith.constant 0 : index
    %c0_0 = arith.constant 0 : index
    %0 = vector.load %arg1[%c0, %c0_0] : memref<16x128xf32, #tpu.memory_space<vmem>>, vector<16x128xf32>
    %c0_1 = arith.constant 0 : index
    %c0_2 = arith.constant 0 : index
    %1 = vector.load %arg2[%c0_1, %c0_2] : memref<128x128xf32, #tpu.memory_space<vmem>>, vector<128x128xf32>
    %cst = arith.constant dense<0.000000e+00> : vector<16x128xf32>
    %2 = tpu.matmul %0, %1, %cst {dimension_numbers = #tpu.dot_dimension_numbers<[1], [0], [0], [1], [0, 0, 1, 1], [], []>} : vector<16x128xf32>, vector<128x128xf32>, vector<16x128xf32> -> vector<16x128xf32>
    %c0_3 = arith.constant 0 : index
    %c0_4 = arith.constant 0 : index
    %3 = vector.load %arg3[%c0_3, %c0_4] : memref<128x256xf32, #tpu.memory_space<vmem>>, vector<128x256xf32>
    %cst_5 = arith.constant dense<0.000000e+00> : vector<16x256xf32>
    %4 = tpu.matmul %0, %3, %cst_5 {dimension_numbers = #tpu.dot_dimension_numbers<[1], [0], [0], [1], [0, 0, 1, 1], [], []>} : vector<16x128xf32>, vector<128x256xf32>, vector<16x256xf32> -> vector<16x256xf32>
    %cst_6 = arith.constant 0.000000e+00 : f32
    %5 = vector.broadcast %cst_6 : f32 to vector<16x256xf32>
    %6 = arith.maximumf %4, %5 : vector<16x256xf32>
    %c0_7 = arith.constant 0 : index
    %c0_8 = arith.constant 0 : index
    %7 = vector.load %arg4[%c0_7, %c0_8] : memref<256x128xf32, #tpu.memory_space<vmem>>, vector<256x128xf32>
    %cst_9 = arith.constant dense<0.000000e+00> : vector<16x128xf32>
    %8 = tpu.matmul %6, %7, %cst_9 {dimension_numbers = #tpu.dot_dimension_numbers<[1], [0], [0], [1], [0, 0, 1, 1], [], []>} : vector<16x256xf32>, vector<256x128xf32>, vector<16x128xf32> -> vector<16x128xf32>
    %9 = arith.addf %2, %8 : vector<16x128xf32>
    %c0_10 = arith.constant 0 : index
    %c0_11 = arith.constant 0 : index
    %10 = vector.load %arg5[%c0_10, %c0_11] : memref<16x128xf32, #tpu.memory_space<vmem>>, vector<16x128xf32>
    tpu.vector_store %arg5[%c0_10, %c0_11], %9 {strides = array<i32>} : memref<16x128xf32, #tpu.memory_space<vmem>>, vector<16x128xf32>,
    return
  }
  func.func @transform_0(%arg0: i32) -> (i32, i32) {
    %c0_i32 = arith.constant 0 : i32
    %c0_i32_0 = arith.constant 0 : i32
    return %arg0, %c0_i32 : i32, i32
  }
  func.func @transform_1(%arg0: i32) -> (i32, i32) {
    %c0_i32 = arith.constant 0 : i32
    %c0_i32_0 = arith.constant 0 : i32
    %c0_i32_1 = arith.constant 0 : i32
    return %c0_i32, %c0_i32_0 : i32, i32
  }
  func.func @transform_2(%arg0: i32) -> (i32, i32) {
    %c0_i32 = arith.constant 0 : i32
    %c0_i32_0 = arith.constant 0 : i32
    %c0_i32_1 = arith.constant 0 : i32
    return %c0_i32, %c0_i32_0 : i32, i32
  }
  func.func @transform_3(%arg0: i32) -> (i32, i32) {
    %c0_i32 = arith.constant 0 : i32
    %c0_i32_0 = arith.constant 0 : i32
    %c0_i32_1 = arith.constant 0 : i32
    return %c0_i32, %c0_i32_0 : i32, i32
  }
  func.func @transform_4(%arg0: i32) -> (i32, i32) {
    %c0_i32 = arith.constant 0 : i32
    %c0_i32_0 = arith.constant 0 : i32
    return %arg0, %c0_i32 : i32, i32
  }
}

</mosaic_0001>

<bundles_post_ra>
// kernel: tpu_custom_call.1
= control target key start
LH: loop header
LB: loop body
LE: loop exit
PB: predicated region body
PF: predicated region fallthrough
CT: control target
= control target key end

     0   :  { %9 = vsyncpa [#allocation3], 0  ;;  %s684_s0 = inlined_call_operand.hbm [shape: f32[16,128], index: 0, kind: input, shape index: {}]   ;;  %s685_s1 = inlined_call_operand.hbm [shape: f32[128,128], index: 1, kind: input, shape index: {}]   ;;  %s686_s2 = inlined_call_operand.hbm [shape: f32[128,256], index: 2, kind: input, shape index: {}]   ;;  %s687_s3 = inlined_call_operand.hbm [shape: f32[256,128], index: 3, kind: input, shape index: {}]   ;;  %s688_s4 = inlined_call_operand.hbm [shape: f32[16,128], index: 4, kind: output, shape index: {}]  }
   0x1   :  { %10 = vsyncpa [#allocation6], 0 }
   0x2   :  { %11 = vsyncpa [#allocation9], 0 }
   0x3   :  { %12 = vsyncpa [#allocation4], 0  ;;  %s616_s15 = smov [#allocation5]   ;;  %s617_s17 = smov [#allocation2]  }
   0x4   :  { %s30_s16 = sshll.u32 %s616_s15, 4  ;;  %s18_s18 = sshll.u32 %s617_s17, 4  ;;  %s31_s16 = int_to_ptr.vmem [resolvable:$true] %s30_s16  ;;  %s19_s18 = int_to_ptr.vmem [resolvable:$true] %s18_s18 }
   0x5   :  { %s516_s19 = scalar_lea.vmem %s31_s16, 2048  ;;  %p521_p1 = scmp.lt.s32.totalorder %s31_s16, %s31_s16 }
   0x6   :  { %p517_p0 = scmp.ne.s32.totalorder %s31_s16, %s516_s19  ;;  %p522_p2 = scmp.lt.s32.totalorder %s516_s19, %s516_s19 }
   0x8   :  { %p523_p3 = por %p522_p2, %p521_p1 }
   0xa   :  { %p524_p4 = pnand %p523_p3, %p517_p0 }
   0xc   :  { %527 = shalt.err (!%p524_p4)
}
   0xd   :  { %s618_s20 = smov 128   ;;  %s619_s21 = smov 8  }
   0xe   :  { %36 = dma.hbm_to_vmem [thread:$0]  %s685_s1, 2048, %s31_s16, [#allocation6], %s618_s20, %s618_s20, %s619_s21  }
   0xf   :  { %s536_s24 = scalar_lea.vmem %s19_s18, 256  ;;  %p541_p6 = scmp.lt.s32.totalorder %s19_s18, %s19_s18 }
  0x10   :  { %p537_p5 = scmp.ne.s32.totalorder %s19_s18, %s536_s24  ;;  %p542_p7 = scmp.lt.s32.totalorder %s536_s24, %s536_s24 }
  0x12   :  { %p543_p8 = por %p542_p7, %p541_p6 }
  0x14   :  { %p544_p9 = pnand %p543_p8, %p537_p5 }
  0x16   :  { %547 = shalt.err (!%p544_p9)
}
  0x17   :  { %24 = dma.hbm_to_vmem [thread:$0]  %s684_s0, 256, %s19_s18, [#allocation3], %s618_s20, %s618_s20, %s619_s21  }
  0x18   :  { %s620_s27 = smov [#allocation7]  }
  0x19   :  { %s42_s28 = sshll.u32 %s620_s27, 4  ;;  %s43_s28 = int_to_ptr.vmem [resolvable:$true] %s42_s28 }
  0x1a   :  { %s556_s29 = scalar_lea.vmem %s43_s28, 4096  ;;  %p561_p11 = scmp.lt.s32.totalorder %s43_s28, %s43_s28 }
  0x1b   :  { %p557_p10 = scmp.ne.s32.totalorder %s43_s28, %s556_s29  ;;  %p562_p12 = scmp.lt.s32.totalorder %s556_s29, %s556_s29 }
  0x1d   :  { %p563_p13 = por %p562_p12, %p561_p11 }
  0x1f   :  { %p564_p0 = pnand %p563_p13, %p557_p10 }
  0x21   :  { %567 = shalt.err (!%p564_p0)
}
  0x22   :  { %s621_s1 = smov 256   ;;  %s622_s30 = smov 16  }
  0x23   :  { %48 = dma.hbm_to_vmem [thread:$0]  %s686_s2, 4096, %s43_s28, [#allocation6], %s621_s1, %s621_s1, %s622_s30  }
  0x24   :  { %s623_s7 = smov [#allocation8]  }
  0x25   :  { %s54_s8 = sshll.u32 %s623_s7, 4  ;;  %s55_s8 = int_to_ptr.vmem [resolvable:$true] %s54_s8 }
  0x26   :  { %s576_s0 = scalar_lea.vmem %s55_s8, 4096  ;;  %p581_p2 = scmp.lt.s32.totalorder %s55_s8, %s55_s8 }
  0x27   :  { %p577_p1 = scmp.ne.s32.totalorder %s55_s8, %s576_s0  ;;  %p582_p3 = scmp.lt.s32.totalorder %s576_s0, %s576_s0 }
  0x29   :  { %p583_p4 = por %p582_p3, %p581_p2 }
  0x2b   :  { %p584_p5 = pnand %p583_p4, %p577_p1 }
  0x2d   :  { %587 = shalt.err (!%p584_p5)
}
  0x2e   :  { %60 = dma.hbm_to_vmem [thread:$0]  %s687_s3, 4096, %s55_s8, [#allocation9], %s618_s20, %s618_s20, %s619_s21  }
  0x2f   :  { %608 = dma.done.wait [#allocation3], 256  }
  0x30   :  { %609 = vsyncadd [#allocation3], 4294967040 }
  0x31   :  { %610 = dma.done.wait [#allocation6], 6144  }
  0x32   :  { %611 = vsyncadd [#allocation6], 4294961152 }
  0x33   :  { %612 = dma.done.wait [#allocation9], 4096  }
  0x34   :  { %613 = vsyncadd [#allocation9], 4294963200  ;;  %v624_v0 = vmov 0.0   ;;  %v122_v1 = vld [vmem:[#allocation7 + $0xf8] sm:$0xff]  ;;  %v121_v2 = vld [vmem:[#allocation7 + $0xf0] sm:$0xff]  ;;  %s625_s2 = smov [#allocation10]  }
  0x35   :  { %187 = vmatprep.mubr.f32.mxu0 %v624_v0  ;;  %v120_v3 = vld [vmem:[#allocation7 + $0xe8] sm:$0xff]  ;;  %123 = vmatprep.subr.mxu0 %v122_v1  ;;  %v119_v4 = vld [vmem:[#allocation7 + $0xe0] sm:$0xff]  ;;  %v118_v5 = vld [vmem:[#allocation7 + $0xd8] sm:$0xff]  ;;  %s393_s3 = sshll.u32 %s625_s2, 4  ;;  %s394_s3 = int_to_ptr.vmem [resolvable:$true] %s393_s3 }
  0x36   :  { %124 = vmatpush1.msra.mxu0 %v121_v2  ;;  %v117_v6 = vld [vmem:[#allocation7 + $0xd0] sm:$0xff]  ;;  %v116_v7 = vld [vmem:[#allocation7 + $0xc8] sm:$0xff]  ;;  %v115_v8 = vld [vmem:[#allocation7 + $0xc0] sm:$0xff]  ;;  %s588_s11 = scalar_lea.vmem %s394_s3, 256  ;;  %p593_p7 = scmp.lt.s32.totalorder %s394_s3, %s394_s3 }
  0x37   :  { %125 = vmatprep.subr.mxu0 %v120_v3  ;;  %v114_v9 = vld [vmem:[#allocation7 + $0xb8] sm:$0xff]  ;;  %v113_v10 = vld [vmem:[#allocation7 + $0xb0] sm:$0xff]  ;;  %v112_v11 = vld [vmem:[#allocation7 + $0xa8] sm:$0xff]  ;;  %p589_p6 = scmp.ne.s32.totalorder %s394_s3, %s588_s11  ;;  %p594_p8 = scmp.lt.s32.totalorder %s588_s11, %s588_s11 }
  0x38   :  { %126 = vmatpush1.msra.mxu0 %v119_v4  ;;  %v111_v12 = vld [vmem:[#allocation7 + $0xa0] sm:$0xff]  ;;  %v110_v13 = vld [vmem:[#allocation7 + $0x98] sm:$0xff]  ;;  %v109_v14 = vld [vmem:[#allocation7 + $0x90] sm:$0xff] }
  0x39   :  { %127 = vmatprep.subr.mxu0 %v118_v5  ;;  %v235_v15 = vld [vmem:[#allocation8 + $0xf8] sm:$0xff]  ;;  %v108_v17 = vld [vmem:[#allocation7 + $0x88] sm:$0xff]  ;;  %v234_v18 = vld [vmem:[#allocation8 + $0xf0] sm:$0xff]  ;;  %p595_p9 = por %p594_p8, %p593_p7 }
  0x3a   :  { %128 = vmatpush1.msra.mxu0 %v117_v6  ;;  %v219_v16 = vld [vmem:[#allocation8 + $0x78] sm:$0xff]  ;;  %407 = vmatprep.subr.mxu1 %v235_v15  ;;  %v218_v19 = vld [vmem:[#allocation8 + $0x70] sm:$0xff]  ;;  %v107_v20 = vld [vmem:[#allocation7 + $0x80] sm:$0xff] }
  0x3b   :  { %129 = vmatprep.subr.mxu0 %v116_v7  ;;  %408 = vmatpush3.msra.mxu1 %v219_v16  ;;  %v233_v21 = vld [vmem:[#allocation8 + $0xe8] sm:$0xff]  ;;  %v106_v22 = vld [vmem:[#allocation7 + $0x78] sm:$0xff]  ;;  %v105_v24 = vld [vmem:[#allocation7 + $0x70] sm:$0xff]  ;;  %p596_p10 = pnand %p595_p9, %p589_p6 }
  0x3c   :  { %130 = vmatpush1.msra.mxu0 %v115_v8  ;;  %409 = vmatprep.subr.mxu1 %v234_v18  ;;  %v217_v23 = vld [vmem:[#allocation8 + $0x68] sm:$0xff]  ;;  %v232_v25 = vld [vmem:[#allocation8 + $0xe0] sm:$0xff]  ;;  %v231_v29 = vld [vmem:[#allocation8 + $0xd8] sm:$0xff] }
  0x3d   :  { %131 = vmatprep.subr.mxu0 %v114_v9  ;;  %410 = vmatpush3.msra.mxu1 %v218_v19  ;;  %v104_v26 = vld [vmem:[#allocation7 + $0x68] sm:$0xff]  ;;  %v216_v27 = vld [vmem:[#allocation8 + $0x60] sm:$0xff]  ;;  %v102_v30 = vld [vmem:[#allocation7 + $0x58] sm:$0xff] }
  0x3e   :  { %132 = vmatpush1.msra.mxu0 %v113_v10  ;;  %411 = vmatprep.subr.mxu1 %v233_v21  ;;  %v103_v28 = vld [vmem:[#allocation7 + $0x60] sm:$0xff]  ;;  %v215_v31 = vld [vmem:[#allocation8 + $0x58] sm:$0xff]  ;;  %v101_v32 = vld [vmem:[#allocation7 + $0x50] sm:$0xff] }
  0x3f   :  { %133 = vmatprep.subr.mxu0 %v112_v11  ;;  %412 = vmatpush3.msra.mxu1 %v217_v23  ;;  %v230_v33 = vld [vmem:[#allocation8 + $0xd0] sm:$0xff]  ;;  %v100_v34 = vld [vmem:[#allocation7 + $0x48] sm:$0xff]  ;;  %v99_v36 = vld [vmem:[#allocation7 + $0x40] sm:$0xff] }
  0x40   :  { %134 = vmatpush1.msra.mxu0 %v111_v12  ;;  %413 = vmatprep.subr.mxu1 %v232_v25  ;;  %v214_v35 = vld [vmem:[#allocation8 + $0x50] sm:$0xff]  ;;  %v229_v37 = vld [vmem:[#allocation8 + $0xc8] sm:$0xff]  ;;  %v98_v38 = vld [vmem:[#allocation7 + $0x38] sm:$0xff] }
  0x41   :  { %135 = vmatprep.subr.mxu0 %v110_v13  ;;  %414 = vmatpush3.msra.mxu1 %v216_v27  ;;  %v213_v39 = vld [vmem:[#allocation8 + $0x48] sm:$0xff]  ;;  %v97_v40 = vld [vmem:[#allocation7 + $0x30] sm:$0xff]  ;;  %v228_v41 = vld [vmem:[#allocation8 + $0xc0] sm:$0xff] }
  0x42   :  { %136 = vmatpush1.msra.mxu0 %v109_v14  ;;  %415 = vmatprep.subr.mxu1 %v231_v29  ;;  %v96_v42 = vld [vmem:[#allocation7 + $0x28] sm:$0xff]  ;;  %v212_v43 = vld [vmem:[#allocation8 + $0x40] sm:$0xff]  ;;  %v227_v45 = vld [vmem:[#allocation8 + $0xb8] sm:$0xff] }
  0x43   :  { %137 = vmatprep.subr.mxu0 %v108_v17  ;;  %416 = vmatpush3.msra.mxu1 %v215_v31  ;;  %v95_v44 = vld [vmem:[#allocation7 + $0x20] sm:$0xff]  ;;  %v94_v46 = vld [vmem:[#allocation7 + $0x18] sm:$0xff]  ;;  %v93_v48 = vld [vmem:[#allocation7 + $0x10] sm:$0xff] }
  0x44   :  { %138 = vmatpush1.msra.mxu0 %v107_v20  ;;  %417 = vmatprep.subr.mxu1 %v230_v33  ;;  %v211_v47 = vld [vmem:[#allocation8 + $0x38] sm:$0xff]  ;;  %v226_v49 = vld [vmem:[#allocation8 + $0xb0] sm:$0xff]  ;;  %v92_v50 = vld [vmem:[#allocation7 + $0x8] sm:$0xff] }
  0x45   :  { %139 = vmatprep.subr.mxu0 %v106_v22  ;;  %418 = vmatpush3.msra.mxu1 %v214_v35  ;;  %v210_v51 = vld [vmem:[#allocation8 + $0x30] sm:$0xff]  ;;  %v91_v52 = vld [vmem:[#allocation7] sm:$0xff]  ;;  %v225_v53 = vld [vmem:[#allocation8 + $0xa8] sm:$0xff] }
  0x46   :  { %140 = vmatpush1.msra.mxu0 %v105_v24  ;;  %419 = vmatprep.subr.mxu1 %v229_v37  ;;  %v73_v54 = vld [vmem:[#allocation2] sm:$0xff]  ;;  %v90_v55 = vld [vmem:[#allocation5 + $0x78] sm:$0xff]  ;;  %v209_v57 = vld [vmem:[#allocation8 + $0x28] sm:$0xff] }
  0x47   :  { %141 = vmatprep.subr.mxu0 %v104_v26  ;;  %420 = vmatpush3.msra.mxu1 %v213_v39  ;;  %v89_v56 = vld [vmem:[#allocation5 + $0x70] sm:$0xff]  ;;  %v224_v58 = vld [vmem:[#allocation8 + $0xa0] sm:$0xff]  ;;  %v674_v59 = vld [vmem:[#allocation2 + $0x8] sm:$0xff] }
  0x48   :  { %142 = vmatpush1.msra.mxu0 %v103_v28  ;;  %421 = vmatprep.subr.mxu1 %v228_v41  ;;  %v88_v60 = vld [vmem:[#allocation5 + $0x68] sm:$0xff]  ;;  %v208_v61 = vld [vmem:[#allocation8 + $0x20] sm:$0xff]  ;;  %v223_v63 = vld [vmem:[#allocation8 + $0x98] sm:$0xff] }
  0x49   :  { %143 = vmatprep.subr.mxu0 %v102_v30  ;;  %422 = vmatpush3.msra.mxu1 %v212_v43  ;;  %v87_v62 = vld [vmem:[#allocation5 + $0x60] sm:$0xff]  ;;  %v207_v1 = vld [vmem:[#allocation8 + $0x18] sm:$0xff]  ;;  %v84_v3 = vld [vmem:[#allocation5 + $0x48] sm:$0xff] }
  0x4a   :  { %144 = vmatpush1.msra.mxu0 %v101_v32  ;;  %423 = vmatprep.subr.mxu1 %v227_v45  ;;  %v86_v2 = vld [vmem:[#allocation5 + $0x58] sm:$0xff]  ;;  %v83_v4 = vld [vmem:[#allocation5 + $0x40] sm:$0xff]  ;;  %v81_v6 = vld [vmem:[#allocation5 + $0x30] sm:$0xff] }
  0x4b   :  { %145 = vmatprep.subr.mxu0 %v100_v34  ;;  %424 = vmatpush3.msra.mxu1 %v211_v47  ;;  %v82_v5 = vld [vmem:[#allocation5 + $0x38] sm:$0xff]  ;;  %v80_v7 = vld [vmem:[#allocation5 + $0x28] sm:$0xff]  ;;  %v79_v8 = vld [vmem:[#allocation5 + $0x20] sm:$0xff] }
  0x4c   :  { %146 = vmatpush1.msra.mxu0 %v99_v36  ;;  %425 = vmatprep.subr.mxu1 %v226_v49  ;;  %v222_v9 = vld [vmem:[#allocation8 + $0x90] sm:$0xff]  ;;  %v78_v10 = vld [vmem:[#allocation5 + $0x18] sm:$0xff]  ;;  %v221_v12 = vld [vmem:[#allocation8 + $0x88] sm:$0xff] }
  0x4d   :  { %147 = vmatprep.subr.mxu0 %v98_v38  ;;  %426 = vmatpush3.msra.mxu1 %v210_v51  ;;  %v206_v11 = vld [vmem:[#allocation8 + $0x10] sm:$0xff]  ;;  %v205_v14 = vld [vmem:[#allocation8 + $0x8] sm:$0xff]  ;;  %v220_v15 = vld [vmem:[#allocation8 + $0x80] sm:$0xff] }
  0x4e   :  { %148 = vmatpush1.msra.mxu0 %v97_v40  ;;  %427 = vmatprep.subr.mxu1 %v225_v53  ;;  %v77_v13 = vld [vmem:[#allocation5 + $0x10] sm:$0xff]  ;;  %v76_v16 = vld [vmem:[#allocation5 + $0x8] sm:$0xff]  ;;  %v204_v17 = vld [vmem:[#allocation8] sm:$0xff] }
  0x4f   :  { %149 = vmatprep.subr.mxu0 %v96_v42  ;;  %428 = vmatpush3.msra.mxu1 %v209_v57  ;;  %v75_v18 = vld [vmem:[#allocation5] sm:$0xff] }
  0x50   :  { %150 = vmatpush1.msra.mxu0 %v95_v44  ;;  %429 = vmatprep.subr.mxu1 %v224_v58 }
  0x51   :  { %151 = vmatprep.subr.mxu0 %v94_v46  ;;  %430 = vmatpush3.msra.mxu1 %v208_v61 }
  0x52   :  { %152 = vmatpush1.msra.mxu0 %v93_v48  ;;  %431 = vmatprep.subr.mxu1 %v223_v63 }
  0x53   :  { %153 = vmatprep.subr.mxu0 %v92_v50  ;;  %432 = vmatpush3.msra.mxu1 %v207_v1 }
  0x54   :  { %154 = vmatpush1.msra.mxu0 %v91_v52  ;;  %433 = vmatprep.subr.mxu1 %v222_v9 }
  0x55   :  { %188 = vmatmul.mubr.f32.vlgmr.msra.gmra.mxu0 %v73_v54  ;;  %463 = vmatprep.subr.mxu0 %v90_v55 }
  0x56   :  { %193 = vmatprep.mubr.f32.mxu0 %v624_v0  ;;  %464 = vmatpush3.msra.mxu0 %v90_v55  ;;  %v85_v0 = vld [vmem:[#allocation5 + $0x50] sm:$0xff] }
  0x57   :  { %465 = vmatprep.subr.mxu0 %v89_v56  ;;  %434 = vmatpush3.msra.mxu1 %v206_v11 }
  0x58   :  { %466 = vmatpush3.msra.mxu0 %v89_v56  ;;  %435 = vmatprep.subr.mxu1 %v221_v12 }
  0x59   :  { %194 = vmatmul.mubr.f32.gmra.mxu0 %v674_v59  ;;  %467 = vmatprep.subr.mxu0 %v88_v60 }
  0x5a   :  { %468 = vmatpush3.msra.mxu0 %v88_v60  ;;  %495 = vmatprep.mubr.f32.mxu0 %v73_v54 }
  0x5b   :  { %469 = vmatprep.subr.mxu0 %v87_v62  ;;  %436 = vmatpush3.msra.mxu1 %v205_v14 }
  0x5c   :  { %470 = vmatpush3.msra.mxu0 %v87_v62  ;;  %437 = vmatprep.subr.mxu1 %v220_v15 }
  0x5d   :  { %471 = vmatprep.subr.mxu0 %v86_v2  ;;  %438 = vmatpush3.msra.mxu1 %v204_v17 }
  0x5e   :  { %472 = vmatpush3.msra.mxu0 %v86_v2 }
  0x5f   :  { %473 = vmatprep.subr.mxu0 %v85_v0 }
  0x60   :  { %474 = vmatpush3.msra.mxu0 %v85_v0 }
  0x61   :  { %475 = vmatprep.subr.mxu0 %v84_v3 }
  0x62   :  { %476 = vmatpush3.msra.mxu0 %v84_v3 }
  0x63   :  { %477 = vmatprep.subr.mxu0 %v83_v4 }
  0x64   :  { %478 = vmatpush3.msra.mxu0 %v83_v4 }
  0x65   :  { %479 = vmatprep.subr.mxu0 %v82_v5 }
  0x66   :  { %480 = vmatpush3.msra.mxu0 %v82_v5 }
  0x67   :  { %481 = vmatprep.subr.mxu0 %v81_v6 }
  0x68   :  { %482 = vmatpush3.msra.mxu0 %v81_v6 }
  0x69   :  { %483 = vmatprep.subr.mxu0 %v80_v7 }
  0x6a   :  { %484 = vmatpush3.msra.mxu0 %v80_v7 }
  0x6b   :  { %485 = vmatprep.subr.mxu0 %v79_v8 }
  0x6c   :  { %486 = vmatpush3.msra.mxu0 %v79_v8 }
  0x6d   :  { %487 = vmatprep.subr.mxu0 %v78_v10 }
  0x6e   :  { %488 = vmatpush3.msra.mxu0 %v78_v10 }
  0x6f   :  { %489 = vmatprep.subr.mxu0 %v77_v13 }
  0x70   :  { %490 = vmatpush3.msra.mxu0 %v77_v13 }
  0x71   :  { %491 = vmatprep.subr.mxu0 %v76_v16 }
  0x72   :  { %492 = vmatpush3.msra.mxu0 %v76_v16 }
  0x73   :  { %493 = vmatprep.subr.mxu0 %v75_v18 }
  0x74   :  { %494 = vmatpush3.msra.mxu0 %v75_v18 }
  0x75   :  { %496 = vmatmul.mubr.f32.vlgmr.msra.gmra.mxu0 %v674_v59 }
 0x115   :  { %v189_v19 = vpop.f32.mrf.mxu0 }
 0x116   :  { %v200_v22 = vmax.f32 %v189_v19, 0.0 }
 0x117   :  { %v191_v20 = vpop.f32.mrf.mxu0 }
 0x118   :  { %v201_v21 = vmax.f32 %v191_v20, 0.0 }
 0x119   :  { %v195_v23 = vpop.f32.mrf.mxu0 }
 0x11a   :  { %300 = vmatprep.mubr.f32.mxu1 %v201_v21  ;;  %v202_v26 = vmax.f32 %v195_v23, 0.0 }
 0x11b   :  { %v197_v24 = vpop.f32.mrf.mxu0  ;;  %301 = vmatmul.mubr.f32.vlgmr.msra.gmra.mxu1 %v200_v22 }
 0x11c   :  { %v203_v25 = vmax.f32 %v197_v24, 0.0 }
 0x11e   :  { %305 = vmatprep.mubr.f32.mxu1 %v203_v25 }
 0x11f   :  { %306 = vmatmul.mubr.f32.gmra.mxu1 %v202_v26 }
 0x135   :  { %v497_v27 = vpop.f32.mrf.mxu0 }
 0x137   :  { %v377_v30 = vpop.f32.mrf.mxu0 }
 0x1db   :  { %v439_v28 = vpop.f32.mrf.mxu1 }
 0x1dd   :  { %v440_v29 = vpop.f32.mrf.mxu1 }
 0x1de   :  { %v441_v31 = vadd.f32 %v440_v29, %v439_v28 }
 0x1df   :  { %v442_v32 = vpop.f32.mrf.mxu1 }
 0x1e0   :  { %v378_v33 = vadd.f32 %v441_v31, %v377_v30 }
 0x1e1   :  { %v443_v34 = vpop.f32.mrf.mxu1 }
 0x1e2   :  { %386 = vst [vmem:[#allocation10] sm:$0xff] %v378_v33  ;;  %v444_v35 = vadd.f32 %v443_v34, %v442_v32 }
 0x1e4   :  { %v383_v36 = vadd.f32 %v497_v27, %v444_v35 }
 0x1e6   :  { %387 = vst [vmem:[#allocation10 + $0x8] sm:$0xff] %v383_v36 }
 0x1e7   :  { %599 = shalt.err (!%p596_p10)
}
 0x1e8   :  { %399 = dma.vmem_to_hbm [thread:$0]  %s394_s3, 256, %s688_s4, [#allocation4], %s618_s20, %s618_s20, %s619_s21  }
 0x1e9   :  { %614 = dma.done.wait [#allocation4], 256  }
 0x1ea   :  { %615 = vsyncadd [#allocation4], 4294967040 }
 0x1eb   :  { %403 = vsyncpa [#allocation3], 1 }
 0x1ec   :  { %404 = vsyncpa [#allocation6], 1 }
 0x1ed   :  { %405 = vsyncpa [#allocation9], 1 }
 0x1ee   :  { %406 = vsyncpa [#allocation4], 1 }

</bundles_post_ra>
